<compile_context>
chip_gen: v7x
topology: tpu7x:2x2x1
jax: 0.10.0
libtpu: 0.0.40
codegen_flags: <defaults>
</compile_context>

<pallas_src>
import functools
import math

import jax
import jax.numpy as jnp
from jax.experimental import pallas as pl
from jax.experimental.pallas import tpu as pltpu


# ------------------------------ kernels -------------------------------------

def _gcn_core(h, w_ref, s_ref, agg_ref, sum_ref, sq_ref, gemm_dtype):
    """Shared tail: feature transform, propagation, write agg + partial stats.

    h:        (L, Bt*Cin)   fp32 activations of the current batch tile
    w_ref:    (Bt*Cin, Bt*Cout)  block-diagonal I_Bt (x) W   (gemm_dtype)
    s_ref:    (L, L)        normalized adjacency (gemm_dtype)
    agg_ref:  (L, Bt*Cout)  output tile (fp32)
    sum_ref:  (1, 1, Bt*Cout) per-tile column sums (for BN mean)
    sq_ref:   (1, 1, Bt*Cout) per-tile column sums of squares (for BN var)
    """
    hw = jnp.dot(h.astype(gemm_dtype), w_ref[...],
                 preferred_element_type=jnp.float32)          # (L, Bt*Cout)
    agg = jnp.dot(s_ref[...], hw.astype(gemm_dtype),
                  preferred_element_type=jnp.float32)         # (L, Bt*Cout)
    agg_ref[...] = agg
    # partial BatchNorm statistics (sublane reduction, stays lane-dense)
    sum_ref[...] = jnp.sum(agg, axis=0, keepdims=True)[None]
    sq_ref[...] = jnp.sum(agg * agg, axis=0, keepdims=True)[None]


def _gcn_first_kernel(h_ref, w_ref, s_ref, agg_ref, sum_ref, sq_ref, *,
                      gemm_dtype):
    """Layer 1: raw input tile -> agg1 + stats (no BN/ReLU on the input)."""
    _gcn_core(h_ref[...], w_ref, s_ref, agg_ref, sum_ref, sq_ref, gemm_dtype)


def _gcn_bn_kernel(h_ref, scale_ref, shift_ref, w_ref, s_ref,
                   agg_ref, sum_ref, sq_ref, *, gemm_dtype):
    """Layer i>1: fused BN(scale,shift)+ReLU of the previous agg, then GCN."""
    h = jnp.maximum(h_ref[...] * scale_ref[...] + shift_ref[...], 0.0)
    _gcn_core(h, w_ref, s_ref, agg_ref, sum_ref, sq_ref, gemm_dtype)


def _bn_relu_kernel(agg_ref, scale_ref, shift_ref, o_ref):
    """Final BN3 + ReLU, applied in the lane-dense layout."""
    o_ref[...] = jnp.maximum(agg_ref[...] * scale_ref[...] + shift_ref[...], 0.0)


# ------------------------------- glue ---------------------------------------

def _lcm(a, b):
    return a * b // math.gcd(a, b)


def _pick_tile_b(B, channels, max_bt=32):
    """Largest batch-tile Bt <= max_bt dividing B such that Bt*C is a multiple
    of 128 for every channel width C (lane-aligned blocks).  Falls back to a
    single full-array tile (always legal) if no such Bt exists."""
    req = 1
    for c in channels:
        req = _lcm(req, 128 // math.gcd(128, int(c)))
    bt = B
    for cand in range((max_bt // req) * req, 0, -req):
        if B % cand == 0:
            bt = cand
            break
    return bt


def _gcn_norm(edge_index, num_nodes, improved=True):
    """Dense S = D^-1/2 (A + fill*I) D^-1/2 matching torch_geometric gcn_norm."""
    fill = 2.0 if improved else 1.0
    src, dst = edge_index[0], edge_index[1]
    a = jnp.zeros((num_nodes, num_nodes), jnp.float32)
    a = a.at[dst, src].add(1.0)                    # message flows src -> dst
    a = a + fill * jnp.eye(num_nodes, dtype=jnp.float32)
    deg = jnp.sum(a, axis=1)
    dinv = jnp.where(deg > 0, jax.lax.rsqrt(deg), 0.0)
    return dinv[:, None] * a * dinv[None, :]


def _xavier_normal(key, shape):
    fan_in, fan_out = shape
    std = (2.0 / (fan_in + fan_out)) ** 0.5
    return std * jax.random.normal(key, shape, dtype=jnp.float32)


def init_params(key, channels):
    """Parameters matching GCN1dBlock.__init__ (conv bias kept for fidelity but
    it is mathematically inert: a pre-BN per-channel constant cancels in BN)."""
    k1, k2, k3 = jax.random.split(key, 3)
    params = {}
    for i, k in zip((1, 2, 3), (k1, k2, k3)):
        c_in, c_out = channels[i - 1], channels[i]
        params[f'w{i}'] = _xavier_normal(k, (c_in, c_out))
        params[f'b{i}'] = jnp.zeros((c_out,), jnp.float32)   # unused by kernels
        params[f'g{i}'] = jnp.ones((c_out,), jnp.float32)    # BN gamma
        params[f'be{i}'] = jnp.zeros((c_out,), jnp.float32)  # BN beta
    return params


def gcn1d_block(x, edge_index, params, *, gemm_dtype=jnp.float32, eps=1e-5):
    """x: (b, n, c, l) float32, edge_index: (2, E) int32 over l nodes.
    Returns (b*n, channels[3], l), matching the torch forward (training-mode
    BatchNorm, i.e. biased batch statistics)."""
    b, n, c0, l = x.shape
    B = b * n
    chans = (c0, params['w1'].shape[1], params['w2'].shape[1],
             params['w3'].shape[1])
    assert params['w1'].shape[0] == c0

    bt = _pick_tile_b(B, chans)          # graphs per grid step
    nt = B // bt
    n_nodes = B * l                      # BatchNorm1d reduces over all nodes

    # shared normalized adjacency (all B graphs use the same edge_index)
    s = _gcn_norm(edge_index, l, improved=True).astype(gemm_dtype)   # (L, L)

    # one input-side transpose of the smallest tensor into the lane-dense
    # (L, B*C0) layout; all later intermediates stay in this layout.
    xg = jnp.transpose(x.reshape(B, c0, l), (2, 0, 1)).reshape(l, B * c0)
    xg = xg.astype(jnp.float32)

    # block-diagonal weights: I_Bt (x) W -> a single lane-dense 2-D GEMM per tile
    def blk(w):
        return jnp.kron(jnp.eye(bt, dtype=jnp.float32), w).astype(gemm_dtype)

    w_blks = (blk(params['w1']), blk(params['w2']), blk(params['w3']))

    cp = pltpu.CompilerParams(dimension_semantics=("parallel",),
                              vmem_limit_bytes=32 * 1024 * 1024)

    def act_spec(cw):                    # (L, B*cw), tiled over the batch axis
        return pl.BlockSpec((l, bt * cw), lambda j: (0, j))

    def full_spec(shape):                # small constant operands, untiled
        nd = len(shape)
        return pl.BlockSpec(tuple(shape), lambda j: (0,) * nd)

    def stats_spec(cw):
        return pl.BlockSpec((1, 1, bt * cw), lambda j: (j, 0, 0))

    def stats_shape(cw):
        return jax.ShapeDtypeStruct((nt, 1, bt * cw), jnp.float32)

    def run_layer(h, w_blk, cin, cout, scale=None, shift=None):
        if scale is None:
            kern = functools.partial(_gcn_first_kernel, gemm_dtype=gemm_dtype)
            ins = (h, w_blk, s)
            in_specs = [act_spec(cin), full_spec(w_blk.shape), full_spec(s.shape)]
        else:
            kern = functools.partial(_gcn_bn_kernel, gemm_dtype=gemm_dtype)
            ins = (h, scale, shift, w_blk, s)
            in_specs = [act_spec(cin), full_spec(scale.shape),
                        full_spec(shift.shape), full_spec(w_blk.shape),
                        full_spec(s.shape)]
        return pl.pallas_call(
            kern,
            grid=(nt,),
            in_specs=in_specs,
            out_specs=(act_spec(cout), stats_spec(cout), stats_spec(cout)),
            out_shape=(jax.ShapeDtypeStruct((l, B * cout), jnp.float32),
                       stats_shape(cout), stats_shape(cout)),
            compiler_params=cp,
        )(*ins)

    def fold_stats(psum, psq, gamma, beta, cout):
        """Cross-tile reduction of partial sums -> fused BN scale/shift,
        pre-tiled so they broadcast over the lane-dense (L, Bt*C) blocks."""
        tot = psum.reshape(-1, cout).sum(axis=0)
        tot2 = psq.reshape(-1, cout).sum(axis=0)
        mean = tot / n_nodes
        var = tot2 / n_nodes - mean * mean
        scale = gamma * jax.lax.rsqrt(var + eps)
        shift = beta - mean * scale
        return (jnp.tile(scale, bt).reshape(1, bt * cout),
                jnp.tile(shift, bt).reshape(1, bt * cout))

    # layer 1
    agg1, ps1, pq1 = run_layer(xg, w_blks[0], chans[0], chans[1])
    sc1, sh1 = fold_stats(ps1, pq1, params['g1'], params['be1'], chans[1])
    # layer 2 (BN1 + ReLU fused into its kernel)
    agg2, ps2, pq2 = run_layer(agg1, w_blks[1], chans[1], chans[2], sc1, sh1)
    sc2, sh2 = fold_stats(ps2, pq2, params['g2'], params['be2'], chans[2])
    # layer 3 (BN2 + ReLU fused into its kernel)
    agg3, ps3, pq3 = run_layer(agg2, w_blks[2], chans[2], chans[3], sc2, sh2)
    sc3, sh3 = fold_stats(ps3, pq3, params['g3'], params['be3'], chans[3])

    # final BN3 + ReLU (separate pass: its stats need all tiles of agg3)
    c3 = chans[3]
    y = pl.pallas_call(
        _bn_relu_kernel,
        grid=(nt,),
        in_specs=[act_spec(c3), full_spec(sc3.shape), full_spec(sh3.shape)],
        out_specs=act_spec(c3),
        out_shape=jax.ShapeDtypeStruct((l, B * c3), jnp.float32),
        compiler_params=cp,
    )(agg3, sc3, sh3)

    # one output-side transpose of the (small) final tensor back to the
    # module's (B, C3, L) layout (kept in XLA for lowering robustness).
    return jnp.transpose(y.reshape(l, B, c3), (1, 2, 0))


# --------------------- pure-JAX reference (torch semantics) -----------------

def _reference(x, edge_index, params):
    b, n, c, l = x.shape
    B = b * n
    h = jnp.transpose(x.reshape(B, c, l), (0, 2, 1)).astype(jnp.float32)
    s = _gcn_norm(edge_index, l, improved=True)
    for i in (1, 2, 3):
        hw = jnp.einsum('blc,cd->bld', h, params[f'w{i}'])
        agg = jnp.einsum('kl,bld->bkd', s, hw) + params[f'b{i}']
        mean = jnp.mean(agg, axis=(0, 1), keepdims=True)
        var = jnp.mean((agg - mean) ** 2, axis=(0, 1), keepdims=True)
        xn = (agg - mean) * jax.lax.rsqrt(var + 1e-5)
        h = jnp.maximum(xn * params[f'g{i}'] + params[f'be{i}'], 0.0)
    return jnp.transpose(h, (0, 2, 1))


if __name__ == "__main__":
    key = jax.random.PRNGKey(0)
    kx1, kx2, kp = jax.random.split(key, 3)

    channels = (4, 8, 16, 8)
    l = 16
    # undirected ring graph on l nodes (both edge directions)
    src = jnp.arange(l, dtype=jnp.int32)
    dst = (src + 1) % l
    edge_index = jnp.stack([jnp.concatenate([src, dst]),
                            jnp.concatenate([dst, src])], axis=0)

    params = init_params(kp, channels)

    # test 1: tiny batch -> single-tile path (block == full array)
    b, n = 2, 2
    x1 = jax.random.normal(kx1, (b, n, channels[0], l), dtype=jnp.float32)
    out1 = jax.block_until_ready(gcn1d_block(x1, edge_index, params))
    ref1 = _reference(x1, edge_index, params)
    assert out1.shape == (b * n, channels[3], l), out1.shape
    assert jnp.allclose(out1, ref1, atol=2e-4, rtol=2e-4), \
        float(jnp.max(jnp.abs(out1 - ref1)))

    # test 2: larger batch -> multi-tile grid path (B=64 -> Bt=32, 2 tiles,
    # lane widths 128..512, both TensorCores usable on v7x)
    b2, n2 = 8, 8
    x2 = jax.random.normal(kx2, (b2, n2, channels[0], l), dtype=jnp.float32)
    out2 = jax.block_until_ready(gcn1d_block(x2, edge_index, params))
    ref2 = _reference(x2, edge_index, params)
    assert out2.shape == (b2 * n2, channels[3], l), out2.shape
    assert jnp.allclose(out2, ref2, atol=2e-4, rtol=2e-4), \
        float(jnp.max(jnp.abs(out2 - ref2)))

    print("KERNEL_OK")
</pallas_src>

<mosaic_0001>
module attributes {stable_mosaic.version = 11 : i64} {
  func.func @_gcn_first_kernel(%arg0: i32, %arg1: memref<16x16xf32, #tpu.memory_space<vmem>>, %arg2: memref<16x32xf32, #tpu.memory_space<vmem>>, %arg3: memref<16x16xf32, #tpu.memory_space<vmem>>, %arg4: memref<16x32xf32, #tpu.memory_space<vmem>>, %arg5: memref<1x1x32xf32, #tpu.memory_space<vmem>>, %arg6: memref<1x1x32xf32, #tpu.memory_space<vmem>>) attributes {dimension_semantics = [#tpu.dimension_semantics<parallel>], iteration_bounds = array<i64: 1>, scalar_prefetch = 0 : i64, scratch_operands = 0 : i64, tpu.core_type = #tpu.core_type<tc>, window_params = [{transform_indices = @transform_0, window_bounds = array<i64: 16, 16>}, {pipeline_mode = #tpu.pipeline_mode<synchronous>, transform_indices = @transform_1, window_bounds = array<i64: 16, 32>}, {pipeline_mode = #tpu.pipeline_mode<synchronous>, transform_indices = @transform_2, window_bounds = array<i64: 16, 16>}, {transform_indices = @transform_3, window_bounds = array<i64: 16, 32>}, {transform_indices = @transform_4, window_bounds = array<i64: 1, 1, 32>}, {transform_indices = @transform_5, window_bounds = array<i64: 1, 1, 32>}]} {
    %c0 = arith.constant 0 : index
    %c0_0 = arith.constant 0 : index
    %0 = vector.load %arg1[%c0, %c0_0] : memref<16x16xf32, #tpu.memory_space<vmem>>, vector<16x16xf32>
    %c0_1 = arith.constant 0 : index
    %c0_2 = arith.constant 0 : index
    %1 = vector.load %arg2[%c0_1, %c0_2] : memref<16x32xf32, #tpu.memory_space<vmem>>, vector<16x32xf32>
    %cst = arith.constant dense<0.000000e+00> : vector<16x32xf32>
    %2 = tpu.matmul %0, %1, %cst {dimension_numbers = #tpu.dot_dimension_numbers<[1], [0], [0], [1], [0, 0, 1, 1], [], []>} : vector<16x16xf32>, vector<16x32xf32>, vector<16x32xf32> -> vector<16x32xf32>
    %c0_3 = arith.constant 0 : index
    %c0_4 = arith.constant 0 : index
    %3 = vector.load %arg3[%c0_3, %c0_4] : memref<16x16xf32, #tpu.memory_space<vmem>>, vector<16x16xf32>
    %cst_5 = arith.constant dense<0.000000e+00> : vector<16x32xf32>
    %4 = tpu.matmul %3, %2, %cst_5 {dimension_numbers = #tpu.dot_dimension_numbers<[1], [0], [0], [1], [0, 0, 1, 1], [], []>} : vector<16x16xf32>, vector<16x32xf32>, vector<16x32xf32> -> vector<16x32xf32>
    %c0_6 = arith.constant 0 : index
    %c0_7 = arith.constant 0 : index
    %5 = vector.load %arg4[%c0_6, %c0_7] : memref<16x32xf32, #tpu.memory_space<vmem>>, vector<16x32xf32>
    tpu.vector_store %arg4[%c0_6, %c0_7], %4 {strides = array<i32>} : memref<16x32xf32, #tpu.memory_space<vmem>>, vector<16x32xf32>,
    %cst_8 = arith.constant dense<0.000000e+00> : vector<32xf32>
    %6 = vector.multi_reduction <add>, %4, %cst_8 [0] : vector<16x32xf32> to vector<32xf32>
    %7 = vector.shape_cast %6 : vector<32xf32> to vector<1x32xf32>
    %8 = vector.shape_cast %7 : vector<1x32xf32> to vector<1x1x32xf32>
    %c0_9 = arith.constant 0 : index
    %c0_10 = arith.constant 0 : index
    %c0_11 = arith.constant 0 : index
    %9 = vector.load %arg5[%c0_9, %c0_10, %c0_11] : memref<1x1x32xf32, #tpu.memory_space<vmem>>, vector<1x1x32xf32>
    tpu.vector_store %arg5[%c0_9, %c0_10, %c0_11], %8 {strides = array<i32>} : memref<1x1x32xf32, #tpu.memory_space<vmem>>, vector<1x1x32xf32>,
    %10 = arith.mulf %4, %4 : vector<16x32xf32>
    %cst_12 = arith.constant dense<0.000000e+00> : vector<32xf32>
    %11 = vector.multi_reduction <add>, %10, %cst_12 [0] : vector<16x32xf32> to vector<32xf32>
    %12 = vector.shape_cast %11 : vector<32xf32> to vector<1x32xf32>
    %13 = vector.shape_cast %12 : vector<1x32xf32> to vector<1x1x32xf32>
    %c0_13 = arith.constant 0 : index
    %c0_14 = arith.constant 0 : index
    %c0_15 = arith.constant 0 : index
    %14 = vector.load %arg6[%c0_13, %c0_14, %c0_15] : memref<1x1x32xf32, #tpu.memory_space<vmem>>, vector<1x1x32xf32>
    tpu.vector_store %arg6[%c0_13, %c0_14, %c0_15], %13 {strides = array<i32>} : memref<1x1x32xf32, #tpu.memory_space<vmem>>, vector<1x1x32xf32>,
    return
  }
  func.func @transform_0(%arg0: i32) -> (i32, i32) {
    %c0_i32 = arith.constant 0 : i32
    %c0_i32_0 = arith.constant 0 : i32
    return %c0_i32, %arg0 : i32, i32
  }
  func.func @transform_1(%arg0: i32) -> (i32, i32) {
    %c0_i32 = arith.constant 0 : i32
    %c0_i32_0 = arith.constant 0 : i32
    %c0_i32_1 = arith.constant 0 : i32
    return %c0_i32, %c0_i32_0 : i32, i32
  }
  func.func @transform_2(%arg0: i32) -> (i32, i32) {
    %c0_i32 = arith.constant 0 : i32
    %c0_i32_0 = arith.constant 0 : i32
    %c0_i32_1 = arith.constant 0 : i32
    return %c0_i32, %c0_i32_0 : i32, i32
  }
  func.func @transform_3(%arg0: i32) -> (i32, i32) {
    %c0_i32 = arith.constant 0 : i32
    %c0_i32_0 = arith.constant 0 : i32
    return %c0_i32, %arg0 : i32, i32
  }
  func.func @transform_4(%arg0: i32) -> (i32, i32, i32) {
    %c0_i32 = arith.constant 0 : i32
    %c0_i32_0 = arith.constant 0 : i32
    %c0_i32_1 = arith.constant 0 : i32
    return %arg0, %c0_i32, %c0_i32_0 : i32, i32, i32
  }
  func.func @transform_5(%arg0: i32) -> (i32, i32, i32) {
    %c0_i32 = arith.constant 0 : i32
    %c0_i32_0 = arith.constant 0 : i32
    %c0_i32_1 = arith.constant 0 : i32
    return %arg0, %c0_i32, %c0_i32_0 : i32, i32, i32
  }
}

</mosaic_0001>

<bundles_post_ra>
// kernel: tpu_custom_call.1
= control target key start
LH: loop header
LB: loop body
LE: loop exit
PB: predicated region body
PF: predicated region fallthrough
CT: control target
= control target key end

     0   :  { %11 = vsyncpa [#allocation3], 0  ;;  %s631_s0 = inlined_call_operand.hbm [shape: f32[16,16], index: 0, kind: input, shape index: {}]   ;;  %s632_s1 = inlined_call_operand.hbm [shape: f32[16,32], index: 1, kind: input, shape index: {}]   ;;  %s633_s2 = inlined_call_operand.hbm [shape: f32[16,16], index: 2, kind: input, shape index: {}]   ;;  %s634_s3 = inlined_call_operand.hbm [shape: f32[16,32], index: 3, kind: output, shape index: {0}]   ;;  %s635_s4 = inlined_call_operand.hbm [shape: f32[1,1,32], index: 4, kind: output, shape index: {1}]   ;;  %s636_s5 = inlined_call_operand.hbm [shape: f32[1,1,32], index: 5, kind: output, shape index: {2}]  }
   0x1   :  { %12 = vsyncpa [#allocation6], 0 }
   0x2   :  { %13 = vsyncpa [#allocation4], 0 }
   0x3   :  { %14 = vsyncpa [#allocation10], 0  ;;  %s482_s18 = smov [#allocation5]   ;;  %s483_s20 = smov [#allocation2]  }
   0x4   :  { %s32_s19 = sshll.u32 %s482_s18, 4  ;;  %s20_s21 = sshll.u32 %s483_s20, 4  ;;  %s33_s19 = int_to_ptr.vmem [resolvable:$true] %s32_s19  ;;  %s520_s21 = int_to_ptr.vmem [resolvable:$true] %s20_s21 }
   0x5   :  { %s342_s24 = scalar_lea.hbm %s632_s1, 256 }
   0x6   :  { %p343_p0 = scmp.ne.s32.totalorder %s632_s1, %s342_s24  ;;  %p346_p1 = scmp.lt.u32.totalorder %s342_s24, %s632_s1 }
   0x8   :  { %p348_p2 = pnand %p346_p1, %p343_p0 }
   0xa   :  { %351 = shalt.err (!%p348_p2)
}
   0xb   :  { %s352_s29 = scalar_lea.vmem %s33_s19, 256  ;;  %p357_p4 = scmp.lt.s32.totalorder %s33_s19, %s33_s19 }
   0xc   :  { %p353_p3 = scmp.ne.s32.totalorder %s33_s19, %s352_s29  ;;  %p358_p5 = scmp.lt.s32.totalorder %s352_s29, %s352_s29 }
   0xe   :  { %p359_p6 = por %p358_p5, %p357_p4 }
  0x10   :  { %p360_p7 = pnand %p359_p6, %p353_p3 }
  0x12   :  { %363 = shalt.err (!%p360_p7)
}
  0x13   :  { %s484_s30 = smov 128   ;;  %s485_s6 = smov 8  }
  0x14   :  { %38 = dma.hbm_to_vmem [thread:$0]  %s632_s1, 256, %s33_s19, [#allocation6], %s484_s30, %s484_s30, %s485_s6  }
  0x15   :  { %s364_s11 = scalar_lea.hbm %s631_s0, 256 }
  0x16   :  { %p365_p8 = scmp.ne.s32.totalorder %s631_s0, %s364_s11  ;;  %p368_p9 = scmp.lt.u32.totalorder %s364_s11, %s631_s0 }
  0x18   :  { %p370_p10 = pnand %p368_p9, %p365_p8 }
  0x1a   :  { %373 = shalt.err (!%p370_p10)
}
  0x1b   :  { %s374_s16 = scalar_lea.vmem %s520_s21, 256  ;;  %p379_p12 = scmp.lt.s32.totalorder %s520_s21, %s520_s21 }
  0x1c   :  { %p375_p11 = scmp.ne.s32.totalorder %s520_s21, %s374_s16  ;;  %p380_p13 = scmp.lt.s32.totalorder %s374_s16, %s374_s16 }
  0x1e   :  { %p381_p0 = por %p380_p13, %p379_p12 }
  0x20   :  { %p382_p1 = pnand %p381_p0, %p375_p11 }
  0x22   :  { %385 = shalt.err (!%p382_p1)
}
  0x23   :  { %26 = dma.hbm_to_vmem [thread:$0]  %s631_s0, 256, %s520_s21, [#allocation3], %s484_s30, %s484_s30, %s485_s6  }
  0x24   :  { %s486_s18 = smov [#allocation7]   ;;  %s386_s23 = scalar_lea.hbm %s633_s2, 256 }
  0x25   :  { %s44_s19 = sshll.u32 %s486_s18, 4  ;;  %p387_p2 = scmp.ne.s32.totalorder %s633_s2, %s386_s23  ;;  %s45_s19 = int_to_ptr.vmem [resolvable:$true] %s44_s19 }
  0x26   :  { %p390_p3 = scmp.lt.u32.totalorder %s386_s23, %s633_s2 }
  0x28   :  { %p392_p4 = pnand %p390_p3, %p387_p2 }
  0x2a   :  { %395 = shalt.err (!%p392_p4)
}
  0x2b   :  { %s396_s28 = scalar_lea.vmem %s45_s19, 256  ;;  %p401_p6 = scmp.lt.s32.totalorder %s45_s19, %s45_s19 }
  0x2c   :  { %p397_p5 = scmp.ne.s32.totalorder %s45_s19, %s396_s28  ;;  %p402_p7 = scmp.lt.s32.totalorder %s396_s28, %s396_s28 }
  0x2e   :  { %p403_p8 = por %p402_p7, %p401_p6 }
  0x30   :  { %p404_p9 = pnand %p403_p8, %p397_p5 }
  0x32   :  { %407 = shalt.err (!%p404_p9)
}
  0x33   :  { %50 = dma.hbm_to_vmem [thread:$0]  %s633_s2, 256, %s45_s19, [#allocation6], %s484_s30, %s484_s30, %s485_s6  }
  0x34   :  { %474 = dma.done.wait [#allocation3], 256  }
  0x35   :  { %475 = vsyncadd [#allocation3], 4294967040 }
  0x36   :  { %476 = dma.done.wait [#allocation6], 512  }
  0x37   :  { %477 = vsyncadd [#allocation6], 4294966784  ;;  %vm64_vm0 = vcmask 130048   ;;  %v62_v0 = vld [vmem:[#allocation5] sm:$0xff]  ;;  %v63_v1 = vld [vmem:[#allocation5 + $0x8] sm:$0xff]  ;;  %s487_s2 = smov [#allocation8]  }
  0x38   :  { %v60_v2 = vld [vmem:[#allocation2] sm:$0xff]  ;;  %v326_v3 = vpack.c.bf16 %v63_v1, %v62_v0  ;;  %v61_v4 = vld [vmem:[#allocation2 + $0x8] sm:$0xff]  ;;  %s260_s29 = sshll.u32 %s487_s2, 4  ;;  %vm229_vm1 = vcmask 261120   ;;  %s261_s29 = int_to_ptr.vmem [resolvable:$true] %s260_s29 }
  0x39   :  { %316 = vmatprep.mubr.msk.f32.mxu0 %vm64_vm0, %v60_v2  ;;  %v146_v5 = vld [vmem:[#allocation7] sm:$0xff]  ;;  %v147_v9 = vld [vmem:[#allocation7 + $0x8] sm:$0xff]  ;;  %s408_s7 = scalar_lea.vmem %s261_s29, 256  ;;  %p413_p11 = scmp.lt.s32.totalorder %s261_s29, %s261_s29 }
  0x3a   :  { %327 = vmatprep.subr.bf16.mxu0 %v326_v3  ;;  %323 = vmatprep.mubr.msk.f32.mxu1 %vm64_vm0, %v146_v5  ;;  %p409_p10 = scmp.ne.s32.totalorder %s261_s29, %s408_s7  ;;  %p414_p12 = scmp.lt.s32.totalorder %s408_s7, %s408_s7 }
  0x3b   :  { %329 = vmatpush3.bf16.msra.mxu0 %v326_v3 }
  0x3c   :  { %p415_p13 = por %p414_p12, %p413_p11 }
  0x3e   :  { %317 = vmatmul.mubr.msk.f32.vlgmr.msra.gmra.mrb[0].mxu0 %vm64_vm0, %v61_v4  ;;  %p416_p0 = pnand %p415_p13, %p409_p10 }
 0x111   :  { %v318_v6 = vpop.f32.mrb[0].mxu0 }
 0x112   :  { %v137_v7 = vpop.f32.mrb[1].mxu0 }
 0x113   :  { %v330_v8 = vpack.c.bf16 %v318_v6, %v137_v7 }
 0x115   :  { %331 = vmatprep.subr.bf16.mxu1 %v330_v8 }
 0x116   :  { %333 = vmatpush3.bf16.msra.mxu1 %v330_v8 }
 0x119   :  { %324 = vmatmul.mubr.msk.f32.vlgmr.msra.gmra.mrb[0].mxu1 %vm64_vm0, %v147_v9 }
 0x1ec   :  { %v325_v10 = vpop.f32.mrb[0].mxu1 }
 0x1ed   :  { %v233_v11 = vsel %vm229_vm1, %v325_v10, 0.0  ;;  %v244_v12 = vmul.f32 %v325_v10, %v325_v10  ;;  %231 = vst.msk [vmem:[#allocation8 + $0x8] sm:$0xff] %vm229_vm1, %v325_v10  ;;  %v220_v13 = vpop.f32.mrb[1].mxu1 }
 0x1ee   :  { %230 = vst.msk [vmem:[#allocation8] sm:$0xff] %vm229_vm1, %v220_v13  ;;  %v232_v14 = vsel %vm229_vm1, %v220_v13, 0.0  ;;  %v243_v15 = vmul.f32 %v220_v13, %v220_v13 }
 0x1ef   :  { %v246_v16 = vsel %vm229_vm1, %v244_v12, 0.0  ;;  %v234_v17 = vadd.f32 %v233_v11, %v232_v14 }
 0x1f0   :  { %419 = shalt.err (!%p416_p0)
}
 0x1f1   :  { %s420_s10 = scalar_lea.hbm %s634_s3, 256 }
 0x1f2   :  { %p421_p1 = scmp.ne.s32.totalorder %s634_s3, %s420_s10  ;;  %p424_p2 = scmp.lt.u32.totalorder %s420_s10, %s634_s3 }
 0x1f4   :  { %p426_p3 = pnand %p424_p2, %p421_p1 }
 0x1f6   :  { %429 = shalt.err (!%p426_p3)
}
 0x1f7   :  { %266 = dma.vmem_to_hbm [thread:$0]  %s261_s29, 256, %s634_s3, [#allocation4], %s484_s30, %s484_s30, %s485_s6   ;;  %v245_v18 = vsel %vm229_vm1, %v243_v15, 0.0  ;;  %v235_v19 = vrot.slane %v234_v17, 4  ;;  %vm241_vm2 = vcmask 253952  }
 0x1f8   :  { %v247_v20 = vadd.f32 %v246_v16, %v245_v18  ;;  %s488_s1 = smov [#allocation9]   ;;  %s489_s18 = smov [#allocation11]  }
 0x1f9   :  { %v236_v21 = vadd.f32 %v235_v19, %v234_v17  ;;  %s273_s17 = sshll.u32 %s488_s1, 4  ;;  %s283_s19 = sshll.u32 %s489_s18, 4  ;;  %s274_s17 = int_to_ptr.vmem [resolvable:$true] %s273_s17  ;;  %s598_s19 = int_to_ptr.vmem [resolvable:$true] %s283_s19 }
 0x1fa   :  { %v248_v22 = vrot.slane %v247_v20, 4  ;;  %s430_s3 = scalar_lea.vmem %s274_s17, 16  ;;  %s434_s30 = scalar_lea.vmem %s274_s17, 32 }
 0x1fb   :  { %v237_v23 = vrot.slane %v236_v21, 2  ;;  %p431_p4 = scmp.ne.s32.totalorder %s274_s17, %s430_s3  ;;  %p435_p5 = scmp.lt.s32.totalorder %s274_s17, %s274_s17 }
 0x1fc   :  { %v249_v24 = vadd.f32 %v248_v22, %v247_v20  ;;  %p436_p6 = scmp.lt.s32.totalorder %s434_s30, %s430_s3 }
 0x1fd   :  { %v238_v25 = vadd.f32 %v237_v23, %v236_v21 }
 0x1fe   :  { %v250_v26 = vrot.slane %v249_v24, 2  ;;  %p437_p7 = por %p436_p6, %p435_p5 }
 0x1ff   :  { %v239_v28 = vrot.slane %v238_v25, 1 }
 0x200   :  { %v251_v27 = vadd.f32 %v250_v26, %v249_v24  ;;  %p438_p8 = pnand %p437_p7, %p431_p4 }
 0x201   :  { %v240_v29 = vadd.f32 %v239_v28, %v238_v25 }
 0x202   :  { %v252_v30 = vrot.slane %v251_v27, 1 }
 0x203   :  { %242 = vst.msk [vmem:[#allocation9] sm:$0x1] %vm241_vm2, %v240_v29 }
 0x204   :  { %v253_v31 = vadd.f32 %v252_v30, %v251_v27 }
 0x205   :  { %441 = shalt.err (!%p438_p8)
}
 0x206   :  { %s442_s22 = scalar_lea.hbm %s635_s4, 16 }
 0x207   :  { %p443_p9 = scmp.ne.s32.totalorder %s635_s4, %s442_s22  ;;  %p446_p10 = scmp.lt.u32.totalorder %s442_s22, %s635_s4 }
 0x209   :  { %p448_p11 = pnand %p446_p10, %p443_p9 }
 0x20b   :  { %451 = shalt.err (!%p448_p11)
}
 0x20c   :  { %276 = dma.vmem_to_hbm [thread:$0]  %s274_s17, 16, %s635_s4, [#allocation10]   ;;  %254 = vst.msk [vmem:[#allocation11] sm:$0x1] %vm241_vm2, %v253_v31 }
 0x20d   :  { %s452_s0 = scalar_lea.vmem %s598_s19, 16  ;;  %s456_s21 = scalar_lea.vmem %s598_s19, 32 }
 0x20e   :  { %p453_p12 = scmp.ne.s32.totalorder %s598_s19, %s452_s0  ;;  %p457_p13 = scmp.lt.s32.totalorder %s598_s19, %s598_s19 }
 0x20f   :  { %p458_p0 = scmp.lt.s32.totalorder %s456_s21, %s452_s0 }
 0x211   :  { %p459_p1 = por %p458_p0, %p457_p13 }
 0x213   :  { %p460_p2 = pnand %p459_p1, %p453_p12 }
 0x215   :  { %463 = shalt.err (!%p460_p2)
}
 0x216   :  { %s464_s7 = scalar_lea.hbm %s636_s5, 16 }
 0x217   :  { %p465_p3 = scmp.ne.s32.totalorder %s636_s5, %s464_s7  ;;  %p468_p4 = scmp.lt.u32.totalorder %s464_s7, %s636_s5 }
 0x219   :  { %p470_p5 = pnand %p468_p4, %p465_p3 }
 0x21b   :  { %473 = shalt.err (!%p470_p5)
}
 0x21c   :  { %286 = dma.vmem_to_hbm [thread:$0]  %s598_s19, 16, %s636_s5, [#allocation10]  }
 0x21d   :  { %478 = dma.done.wait [#allocation4], 256  }
 0x21e   :  { %479 = vsyncadd [#allocation4], 4294967040 }
 0x21f   :  { %480 = dma.done.wait [#allocation10], 32  }
 0x220   :  { %481 = vsyncadd [#allocation10], 4294967264 }
 0x221   :  { %296 = vsyncpa [#allocation3], 1 }
 0x222   :  { %297 = vsyncpa [#allocation6], 1 }
 0x223   :  { %298 = vsyncpa [#allocation4], 1 }
 0x224   :  { %299 = vsyncpa [#allocation10], 1 }

</bundles_post_ra>
